<compile_context>
chip_gen: v7x
topology: tpu7x:2x2x1
jax: 0.10.0
libtpu: 0.0.40
codegen_flags: <defaults>
</compile_context>

<pallas_src>
import functools

import jax
import jax.numpy as jnp
from jax.experimental import pallas as pl
from jax.experimental.pallas import tpu as pltpu


# Below this size a pure-JAX broadcast multiply beats paying pallas_call fixed
# cost on a degenerate (1, few) grid.
_MIN_PALLAS_BYTES = 1 * 1024 * 1024


def _row_kernel(x_ref, noise_ref, o_ref):
    # noise_ref is (tb, 1) in x's dtype; single broadcast multiply, no casts.
    o_ref[...] = x_ref[...] * noise_ref[...]


def _pick_tiles(b: int, n: int, itemsize: int):
    """Pick (tb, tn) so each block is ~8 MiB (amortizes ~0.35us/step grid
    overhead) while in+out double-buffering stays ~32 MiB of VMEM."""
    TARGET_BLOCK_BYTES = 8 * 1024 * 1024
    MAX_TN = 8192                      # lane-dense, multiple of 128
    MAX_TB = 1024

    tn = n if n <= MAX_TN else MAX_TN  # full dim OR multiple of 128

    # Sublane packing factor: f32 -> 8, bf16/f16 -> 16, int8/fp8 -> 32.
    sublane = 8 * max(1, 4 // max(1, itemsize))

    tb = min(b, MAX_TB, max(1, TARGET_BLOCK_BYTES // (tn * itemsize)))
    if tb < b:
        # Align to the dtype's sublane packing so output writeback uses
        # unmasked full-sublane stores.
        tb = (tb // sublane) * sublane
        if tb == 0:
            tb = b
    return tb, tn


def stochastic_depth(
    x: jax.Array,
    p: float,
    mode: str,
    seed: int,
    training: bool = True,
    donate_x: bool = False,
) -> jax.Array:
    """Pallas TPU implementation of StochasticDepth.forward."""
    if p < 0.0 or p > 1.0:
        raise ValueError(f"drop probability has to be between 0 and 1, but got {p}")
    if mode not in ("batch", "row"):
        raise ValueError(f"mode has to be either 'batch' or 'row', but got {mode}")
    if (not training) or p == 0.0:
        return x

    survival_rate = 1.0 - p
    scale = (1.0 / survival_rate) if survival_rate > 0.0 else 1.0

    if mode == "batch":
        # Single Bernoulli for the whole tensor: do it at the JAX level.  The
        # dropped branch never touches x (no HBM reads); the kept branch is a
        # trivially fusible scalar multiply that XLA runs at HBM roofline.
        keep = jax.random.bernoulli(jax.random.PRNGKey(seed), survival_rate)
        scale_t = jnp.asarray(scale, dtype=x.dtype)
        return jax.lax.cond(keep, lambda: x * scale_t, lambda: jnp.zeros_like(x))

    # ---- mode == 'row' ----------------------------------------------------
    orig_shape = x.shape
    b = int(orig_shape[0])
    n = 1
    for d in orig_shape[1:]:
        n *= int(d)
    itemsize = jnp.dtype(x.dtype).itemsize

    # Per-row keep/scale computed once in the wrapper (tiling-independent),
    # already in the output dtype so the kernel has zero per-step casts.
    keep = jax.random.bernoulli(jax.random.PRNGKey(seed), survival_rate, shape=(b,))
    noise = jnp.where(keep, scale, 0.0).astype(x.dtype)

    # Small-tensor fallback: a 1-step pallas grid would idle v7x's second core
    # and pay the call fixed cost; XLA's fused multiply is already optimal.
    if b * n * itemsize < _MIN_PALLAS_BYTES:
        return x * noise.reshape((b,) + (1,) * (x.ndim - 1))

    x2 = x.reshape(b, n)
    noise2 = noise.reshape(b, 1)

    tb, tn = _pick_tiles(b, n, itemsize)
    grid = (pl.cdiv(b, tb), pl.cdiv(n, tn))

    out2 = pl.pallas_call(
        _row_kernel,
        out_shape=jax.ShapeDtypeStruct((b, n), x.dtype),
        grid_spec=pltpu.PrefetchScalarGridSpec(
            num_scalar_prefetch=0,
            grid=grid,
            in_specs=[
                pl.BlockSpec((tb, tn), lambda i, j: (i, j)),   # x tile
                pl.BlockSpec((tb, 1), lambda i, j: (i, 0)),    # per-row noise
            ],
            out_specs=pl.BlockSpec((tb, tn), lambda i, j: (i, j)),
        ),
        compiler_params=pltpu.CompilerParams(
            dimension_semantics=("parallel", "parallel"),
            # ~8 MiB blocks, (in + out) double-buffered ~= 32 MiB; 48 MiB
            # leaves headroom and still fits v7x's 64 MiB per-TC VMEM.
            # TODO(synk): derive per-generation via pltpu.get_tpu_info() when
            # running on real hardware (96 MiB is safe on v5e/v6e).
            vmem_limit_bytes=48 * 1024 * 1024,
        ),
        # Callers that donate x halve peak HBM footprint for big activations.
        input_output_aliases=({0: 0} if donate_x else {}),
    )(x2, noise2)

    return out2.reshape(orig_shape)


def _rows_ok(out, x, survival):
    ok = True
    for bidx in range(x.shape[0]):
        row_zero = bool(jnp.allclose(out[bidx], 0.0, atol=1e-6))
        row_kept = bool(
            jnp.allclose(out[bidx], x[bidx] / survival, atol=1e-5, rtol=1e-5)
        )
        ok = ok and (row_zero or row_kept)
    return ok


if __name__ == "__main__":
    p = 0.2
    survival = 1.0 - p
    ok = True

    # --- small shape (pure-JAX fast path), mode='row' -----------------------
    x_small = jax.random.normal(jax.random.PRNGKey(0), (2, 4, 16, 16), jnp.float32)
    out_small = jax.block_until_ready(
        stochastic_depth(x_small, p=p, mode="row", seed=1234, training=True)
    )
    ok = ok and _rows_ok(out_small, x_small, survival)

    # --- larger shape: exercises the Pallas kernel, mode='row' --------------
    x_big = jax.random.normal(jax.random.PRNGKey(1), (8, 64, 32, 32), jnp.float32)
    out_big = jax.block_until_ready(
        stochastic_depth(x_big, p=p, mode="row", seed=99, training=True)
    )
    ok = ok and _rows_ok(out_big, x_big, survival)

    # --- mode='batch': whole tensor either zeroed or scaled 1/(1-p) ---------
    out_batch = jax.block_until_ready(
        stochastic_depth(x_small, p=p, mode="batch", seed=7, training=True)
    )
    all_zero = bool(jnp.allclose(out_batch, 0.0, atol=1e-6))
    all_kept = bool(jnp.allclose(out_batch, x_small / survival, atol=1e-5, rtol=1e-5))
    ok = ok and (all_zero or all_kept)

    # --- eval mode: identity -------------------------------------------------
    out_eval = jax.block_until_ready(
        stochastic_depth(x_small, p=p, mode="row", seed=1234, training=False)
    )
    ok = ok and bool(jnp.allclose(out_eval, x_small))

    if ok:
        print("KERNEL_OK")
    else:
        raise SystemExit("stochastic depth output did not match expected semantics")
</pallas_src>

<mosaic_0001>
module attributes {stable_mosaic.version = 11 : i64} {
  func.func @_row_kernel(%arg0: i32, %arg1: i32, %arg2: memref<8x8192xf32, #tpu.memory_space<vmem>>, %arg3: memref<8x1xf32, #tpu.memory_space<vmem>>, %arg4: memref<8x8192xf32, #tpu.memory_space<vmem>>) attributes {dimension_semantics = [#tpu.dimension_semantics<parallel>, #tpu.dimension_semantics<parallel>], iteration_bounds = array<i64: 1, 8>, scalar_prefetch = 0 : i64, scratch_operands = 0 : i64, tpu.core_type = #tpu.core_type<tc>, window_params = [{transform_indices = @transform_0, window_bounds = array<i64: 8, 8192>}, {transform_indices = @transform_1, window_bounds = array<i64: 8, 1>}, {transform_indices = @transform_2, window_bounds = array<i64: 8, 8192>}]} {
    %c0 = arith.constant 0 : index
    %c0_0 = arith.constant 0 : index
    %0 = vector.load %arg2[%c0, %c0_0] : memref<8x8192xf32, #tpu.memory_space<vmem>>, vector<8x8192xf32>
    %c0_1 = arith.constant 0 : index
    %c0_2 = arith.constant 0 : index
    %1 = vector.load %arg3[%c0_1, %c0_2] : memref<8x1xf32, #tpu.memory_space<vmem>>, vector<8x1xf32>
    %2 = vector.broadcast %1 : vector<8x1xf32> to vector<8x8192xf32>
    %3 = arith.mulf %0, %2 : vector<8x8192xf32>
    %c0_3 = arith.constant 0 : index
    %c0_4 = arith.constant 0 : index
    %4 = vector.load %arg4[%c0_3, %c0_4] : memref<8x8192xf32, #tpu.memory_space<vmem>>, vector<8x8192xf32>
    tpu.vector_store %arg4[%c0_3, %c0_4], %3 {strides = array<i32>} : memref<8x8192xf32, #tpu.memory_space<vmem>>, vector<8x8192xf32>,
    return
  }
  func.func @transform_0(%arg0: i32, %arg1: i32) -> (i32, i32) {
    %c0_i32 = arith.constant 0 : i32
    return %arg0, %arg1 : i32, i32
  }
  func.func @transform_1(%arg0: i32, %arg1: i32) -> (i32, i32) {
    %c0_i32 = arith.constant 0 : i32
    %c0_i32_0 = arith.constant 0 : i32
    return %arg0, %c0_i32 : i32, i32
  }
  func.func @transform_2(%arg0: i32, %arg1: i32) -> (i32, i32) {
    %c0_i32 = arith.constant 0 : i32
    return %arg0, %arg1 : i32, i32
  }
}

</mosaic_0001>

<bundles_post_ra>
// kernel: tpu_custom_call.1
= control target key start
LH: loop header
LB: loop body
LE: loop exit
PB: predicated region body
PF: predicated region fallthrough
CT: control target
= control target key end

     0   :  { %7 = vsyncpa [#allocation3], 0  ;;  %s1101_s0 = inlined_call_operand.hbm [shape: f32[8,65536], index: 0, kind: input, shape index: {}]   ;;  %s1102_s1 = inlined_call_operand.vmem [shape: f32[8,1], index: 1, kind: input, shape index: {}]   ;;  %s1103_s2 = inlined_call_operand.hbm [shape: f32[8,65536], index: 2, kind: output, shape index: {}]  }
   0x1   :  { %9 = vsyncpa [#allocation3 + $0x1], 0 }
   0x2   :  { %10 = vsyncpa [#allocation4], 0 }
   0x3   :  { %12 = vsyncpa [#allocation4 + $0x1], 0  ;;  %s725_s9 = smov 0   ;;  %s727_s10 = smov 0  }
   0x4   :  { %s729_s11 = smov 0   ;;  %s731_s12 = smov 0  }
   0x5   :  { %s733_s13 = smov 0   ;;  %s735_s14 = smov 0  }
   0x6 LB: > { %s511_s15 = sadd.s32 4294967295, %s705_s14   ;;  %s512_s16 = sadd.s32 4294967294, %s705_s14   ;;  %s705_s14 = sphi %s735_s14, %s18_s14   ;;  %s701_s13 = sphi %s733_s13, %s1118_s13   ;;  %s697_s12 = sphi %s731_s12, %s1117_s12   ;;  %s693_s11 = sphi %s729_s11, %s1116_s11   ;;  %s689_s10 = sphi %s727_s10, %s1115_s10   ;;  %s685_s9 = sphi %s725_s9, %s1114_s9  }
   0x7   : > { %s27_s17 = sadd.s32 1, %s701_s13  ;;  %s39_s18 = sadd.s32 1, %s693_s11 }
   0x8   : > { %p28_p0 = scmp.ge.s32.totalorder %s27_s17, 8  ;;  %p46_p1 = scmp.ne.s32.totalorder %s693_s11, %s689_s10 }
   0x9   : > { %p47_p2 = scmp.eq.s32.totalorder %s705_s14, 0  ;;  %p52_p3 = scmp.ne.s32.totalorder %s689_s10, %s685_s9 }
   0xa   : > { %s1120_s17 = smov (%p28_p0, %s27_s17), 0  ;;  %p53_p5 = scmp.eq.s32.totalorder %s511_s15, 0 }
   0xb   : > { %p766_p4 = por %p47_p2, %p46_p1  ;;  %s35_s20 = ssub.s32 %s701_s13, %s1120_s17 }
   0xc   : > { %p104_p6 = scmp.eq.s32.totalorder %s511_s15, 7  ;;  %p37_p7 = scmp.eq.s32.totalorder %s35_s20, 0 }
   0xd   : > { %p772_p8 = por %p53_p5, %p52_p3  ;;  %p110_p10 = scmp.eq.s32.totalorder %s512_s16, 7 }
   0xe   : > { %p776_p9 = por %p104_p6, %p46_p1  ;;  %p541_p12 = scmp.lt.s32.totalorder %s705_s14, 8 }
   0xf   : > { %s781_s23 = scalar_select %p37_p7, %s693_s11, %s39_s18  }
  0x10   : > { %s1107_s22 = scalar_select %p776_p9, 1, 0 }
  0x11   : > { %p783_p11 = por %p110_p10, %p52_p3  ;;  %s137_s25 = sand.u32 1, %s693_s11  }
  0x12   : > { %s516_s26 = sshll.u32 %s137_s25, 9  ;;  %s527_s27 = sshll.u32 %s701_s13, 13 }
  0x13   : > { %s1108_s24 = scalar_select %p783_p11, 1, 0 }
  0x14   : > { %s793_s30 = scalar_lea.hbm %s1101_s0, %s527_s27  ;;  %s141_s3 = scalar_lea.vmem [#allocation2], %s516_s26 }
  0x15   : > { %s151_s4 = sshll.u32 %s141_s3, 4  ;;  %p799_p13 = pnand %p541_p12, %p766_p4  ;;  %s795_s4 = int_to_ptr.vmem [resolvable:$true] %s151_s4 }
  0x16   : > { %s138_s6 = scalar_lea.sflag [#allocation3], %s137_s25  ;;  %s593_s7 = scalar_lea.hbm %s793_s30, 8192 }
  0x17   : > { %p594_p2 = scmp.ne.s32.totalorder %s793_s30, %s593_s7  ;;  %p595_p3 = pneg %p799_p13 }
  0x18   : > { %s598_s16 = scalar_lea.hbm %s1101_s0, 65536  ;;  %p599_p4 = scmp.lt.u32.totalorder %s793_s30, %s1101_s0 }
  0x19   : > { %p596_p5 = pnand %p595_p3, %p594_p2  ;;  %p600_p7 = scmp.lt.u32.totalorder %s598_s16, %s593_s7 }
  0x1a   : > { %p602_p12 = scmp.lt.u32.totalorder %s593_s7, %s793_s30 }
  0x1b   : > { %p597_p6 = pneg %p596_p5  ;;  %p601_p10 = por %p600_p7, %p599_p4 }
  0x1d   : > { %p603_p0 = por %p602_p12, %p601_p10 }
  0x1f   : > { %p604_p1 = pnand %p603_p0, %p597_p6 }
  0x21   : > { %607 = shalt.err (!%p604_p1)
}
  0x22   : > { %s608_s20 = scalar_lea.vmem %s795_s4, 8192  ;;  %s707_s25 = smov [#allocation2]  }
  0x23   : > { %p609_p2 = scmp.ne.s32.totalorder %s795_s4, %s608_s20  ;;  %s613_s26 = sshll.u32 %s707_s25, 4  ;;  %s614_s26 = int_to_ptr.vmem [resolvable:$false] %s613_s26 }
  0x24   : > { %s615_s27 = scalar_lea.vmem %s614_s26, 16384  ;;  %p616_p9 = scmp.lt.s32.totalorder %s795_s4, %s614_s26 }
  0x25   : > { %p611_p5 = pnand %p609_p2, %p595_p3  ;;  %p617_p4 = scmp.lt.s32.totalorder %s615_s27, %s608_s20 }
  0x27   : > { %p612_p11 = pneg %p611_p5  ;;  %p618_p7 = por %p617_p4, %p616_p9 }
  0x29   : > { %p619_p10 = pnand %p618_p7, %p612_p11 }
  0x2b   : > { %622 = shalt.err (!%p619_p10)
}
  0x2c   : > { %536 = dma.hbm_to_vmem [thread:$0]  (!%p799_p13), %s793_s30, 8192, %s795_s4, %s138_s6  }
  0x2d   : > { %p1110_p0 = scmp.lt.s32.totalorder %s705_s14, 9  ;;  %p1111_p1 = scmp.ge.s32.totalorder %s705_s14, 1 }
  0x2f   : > { %p157_p3 = pnand %p1111_p1, %p1110_p0 }
  0x30   : > { %s835_s28 = sand.u32 (!%p157_p3), 1, %s689_s10  }
  0x31   : > { %160 = sbr.rel (%p157_p3) target bundleno = 235 (0xeb), region = 28  ;;  %s520_s29 = sshll.u32 (!%p157_p3), %s835_s28, 9 }
  0x32   : > { %s163_s3 = scalar_lea.sflag (!%p157_p3), [#allocation3], %s835_s28  ;;  %s841_s5 = scalar_lea.vmem (!%p157_p3), [#allocation2], %s520_s29 }
  0x38   : > { %676 = dma.done.wait (%p772_p8), %s163_s3, 8192  }
  0x39   : > { %678 = vsyncadd (%p772_p8), %s163_s3, 4294959104  ;;  %v708_v0 = vmov 0   ;;  %v261_v1 = vld [vmem:[%s1102_s1] sm:$0xff]  ;;  %v198_v3 = vld [vmem:[%s841_s5 + $0x8] sm:$0xff]  ;;  %s898_s21 = scalar_lea.vmem [#allocation5], %s520_s29  ;;  %s528_s6 = sshll.u32 %s697_s12, 13 }
  0x3a   : > { %592 = vset.pattern.permute.xlu0 %v708_v0  ;;  %v197_v2 = vld [vmem:[%s841_s5] sm:$0xff]  ;;  %v199_v4 = vld [vmem:[%s841_s5 + $0x10] sm:$0xff]  ;;  %v200_v5 = vld [vmem:[%s841_s5 + $0x18] sm:$0xff]  ;;  %s412_s7 = sshll.u32 %s898_s21, 4  ;;  %s1045_s15 = scalar_lea.hbm %s1103_s2, %s528_s6  ;;  %s1047_s7 = int_to_ptr.vmem [resolvable:$true] %s412_s7 }
  0x3b   : > { %264 = vperm.xlu0 %592, %v261_v1   ;;  %v201_v6 = vld [vmem:[%s841_s5 + $0x20] sm:$0xff]  ;;  %v202_v7 = vld [vmem:[%s841_s5 + $0x28] sm:$0xff]  ;;  %v203_v8 = vld [vmem:[%s841_s5 + $0x30] sm:$0xff]  ;;  %s396_s16 = scalar_lea.sflag [#allocation4], %s835_s28  ;;  %s623_s18 = scalar_lea.vmem %s1047_s7, 8192 }
  0x3c   : > { %v204_v9 = vld [vmem:[%s841_s5 + $0x38] sm:$0xff]  ;;  %v205_v10 = vld [vmem:[%s841_s5 + $0x40] sm:$0xff]  ;;  %v206_v11 = vld [vmem:[%s841_s5 + $0x48] sm:$0xff]  ;;  %p624_p8 = scmp.ne.s32.totalorder %s1047_s7, %s623_s18  ;;  %p1112_p9 = scmp.ne.s32.totalorder %s1107_s22, 0 }
  0x3d   : > { %v207_v12 = vld [vmem:[%s841_s5 + $0x50] sm:$0xff]  ;;  %v208_v13 = vld [vmem:[%s841_s5 + $0x58] sm:$0xff]  ;;  %v209_v14 = vld [vmem:[%s841_s5 + $0x60] sm:$0xff]  ;;  %s709_s19 = smov [#allocation5]  }
  0x3e   : > { %v210_v15 = vld [vmem:[%s841_s5 + $0x68] sm:$0xff]  ;;  %v211_v16 = vld [vmem:[%s841_s5 + $0x70] sm:$0xff]  ;;  %v212_v17 = vld [vmem:[%s841_s5 + $0x78] sm:$0xff]  ;;  %p625_p11 = pnand %p624_p8, %p1112_p9  ;;  %s627_s20 = sshll.u32 %s709_s19, 4  ;;  %s628_s20 = int_to_ptr.vmem [resolvable:$false] %s627_s20 }
  0x3f   : > { %v213_v19 = vld [vmem:[%s841_s5 + $0x80] sm:$0xff]  ;;  %v214_v20 = vld [vmem:[%s841_s5 + $0x88] sm:$0xff]  ;;  %v215_v21 = vld [vmem:[%s841_s5 + $0x90] sm:$0xff]  ;;  %s629_s25 = scalar_lea.vmem %s628_s20, 16384  ;;  %p630_p6 = scmp.lt.s32.totalorder %s1047_s7, %s628_s20 }
  0x40   : > { %v216_v22 = vld [vmem:[%s841_s5 + $0x98] sm:$0xff]  ;;  %v217_v23 = vld [vmem:[%s841_s5 + $0xa0] sm:$0xff]  ;;  %v218_v24 = vld [vmem:[%s841_s5 + $0xa8] sm:$0xff]  ;;  %p626_p13 = pneg %p625_p11  ;;  %p631_p12 = scmp.lt.s32.totalorder %s629_s25, %s623_s18 }
  0x41   : > { %v219_v25 = vld [vmem:[%s841_s5 + $0xb0] sm:$0xff]  ;;  %v220_v26 = vld [vmem:[%s841_s5 + $0xb8] sm:$0xff]  ;;  %v221_v31 = vld [vmem:[%s841_s5 + $0xc0] sm:$0xff] }
  0x42   : > { %v222_v32 = vld [vmem:[%s841_s5 + $0xc8] sm:$0xff]  ;;  %v223_v33 = vld [vmem:[%s841_s5 + $0xd0] sm:$0xff]  ;;  %v224_v34 = vld [vmem:[%s841_s5 + $0xd8] sm:$0xff]  ;;  %p632_p2 = por %p631_p12, %p630_p6 }
  0x43   : > { %v225_v39 = vld [vmem:[%s841_s5 + $0xe0] sm:$0xff]  ;;  %v226_v40 = vld [vmem:[%s841_s5 + $0xe8] sm:$0xff]  ;;  %v227_v41 = vld [vmem:[%s841_s5 + $0xf0] sm:$0xff] }
  0x44   : > { %v228_v42 = vld [vmem:[%s841_s5 + $0xf8] sm:$0xff]  ;;  %v229_v47 = vld [vmem:[%s841_s5 + $0x100] sm:$0xff]  ;;  %v230_v48 = vld [vmem:[%s841_s5 + $0x108] sm:$0xff]  ;;  %p633_p5 = pnand %p632_p2, %p626_p13 }
  0x45   : > { %v231_v49 = vld [vmem:[%s841_s5 + $0x110] sm:$0xff]  ;;  %v232_v50 = vld [vmem:[%s841_s5 + $0x118] sm:$0xff]  ;;  %v233_v55 = vld [vmem:[%s841_s5 + $0x120] sm:$0xff] }
  0x46   : > { %v234_v56 = vld [vmem:[%s841_s5 + $0x128] sm:$0xff]  ;;  %v235_v57 = vld [vmem:[%s841_s5 + $0x130] sm:$0xff]  ;;  %v236_v58 = vld [vmem:[%s841_s5 + $0x138] sm:$0xff] }
  0x47   : > { %v237_v63 = vld [vmem:[%s841_s5 + $0x140] sm:$0xff]  ;;  %v238_v0 = vld [vmem:[%s841_s5 + $0x148] sm:$0xff]  ;;  %v239_v1 = vld [vmem:[%s841_s5 + $0x150] sm:$0xff] }
  0xba   : > { %v866_v18 = vpop.permute.xlu0 %264 }
  0xbb   : > { %v267_v27 = vmul.f32 %v866_v18, %v197_v2  ;;  %v268_v28 = vmul.f32 %v866_v18, %v198_v3  ;;  %v269_v29 = vmul.f32 %v866_v18, %v199_v4  ;;  %v270_v30 = vmul.f32 %v866_v18, %v200_v5 }
  0xbc   : > { %v271_v35 = vmul.f32 %v866_v18, %v201_v6  ;;  %v272_v36 = vmul.f32 %v866_v18, %v202_v7  ;;  %v273_v37 = vmul.f32 %v866_v18, %v203_v8  ;;  %v274_v38 = vmul.f32 %v866_v18, %v204_v9  ;;  %v240_v6 = vld [vmem:[%s841_s5 + $0x158] sm:$0xff]  ;;  %v241_v7 = vld [vmem:[%s841_s5 + $0x160] sm:$0xff]  ;;  %v242_v8 = vld [vmem:[%s841_s5 + $0x168] sm:$0xff] }
  0xbd   : > { %v275_v43 = vmul.f32 %v866_v18, %v205_v10  ;;  %v276_v44 = vmul.f32 %v866_v18, %v206_v11  ;;  %v277_v45 = vmul.f32 %v866_v18, %v207_v12  ;;  %v278_v46 = vmul.f32 %v866_v18, %v208_v13  ;;  %331 = vst [vmem:[%s898_s21] sm:$0xff] %v267_v27  ;;  %v243_v13 = vld [vmem:[%s841_s5 + $0x170] sm:$0xff] }
  0xbe   : > { %332 = vst [vmem:[%s898_s21 + $0x8] sm:$0xff] %v268_v28  ;;  %333 = vst [vmem:[%s898_s21 + $0x10] sm:$0xff] %v269_v29  ;;  %v279_v51 = vmul.f32 %v866_v18, %v209_v14  ;;  %v280_v52 = vmul.f32 %v866_v18, %v210_v15  ;;  %v281_v53 = vmul.f32 %v866_v18, %v211_v16  ;;  %v244_v14 = vld [vmem:[%s841_s5 + $0x178] sm:$0xff]  ;;  %v245_v15 = vld [vmem:[%s841_s5 + $0x180] sm:$0xff] }
  0xbf   : > { %334 = vst [vmem:[%s898_s21 + $0x18] sm:$0xff] %v270_v30  ;;  %v282_v54 = vmul.f32 %v866_v18, %v212_v17  ;;  %335 = vst [vmem:[%s898_s21 + $0x20] sm:$0xff] %v271_v35  ;;  %v283_v59 = vmul.f32 %v866_v18, %v213_v19  ;;  %v284_v60 = vmul.f32 %v866_v18, %v214_v20  ;;  %v249_v28 = vld [vmem:[%s841_s5 + $0x1a0] sm:$0xff]  ;;  %v250_v29 = vld [vmem:[%s841_s5 + $0x1a8] sm:$0xff] }
  0xc0   : > { %336 = vst [vmem:[%s898_s21 + $0x28] sm:$0xff] %v272_v36  ;;  %337 = vst [vmem:[%s898_s21 + $0x30] sm:$0xff] %v273_v37  ;;  %v285_v61 = vmul.f32 %v866_v18, %v215_v21  ;;  %v286_v62 = vmul.f32 %v866_v18, %v216_v22  ;;  %v287_v2 = vmul.f32 %v866_v18, %v217_v23  ;;  %v246_v21 = vld [vmem:[%s841_s5 + $0x188] sm:$0xff]  ;;  %v247_v22 = vld [vmem:[%s841_s5 + $0x190] sm:$0xff] }
  0xc1   : > { %338 = vst [vmem:[%s898_s21 + $0x38] sm:$0xff] %v274_v38  ;;  %339 = vst [vmem:[%s898_s21 + $0x40] sm:$0xff] %v275_v43  ;;  %v288_v3 = vmul.f32 %v866_v18, %v218_v24  ;;  %v289_v4 = vmul.f32 %v866_v18, %v219_v25  ;;  %v290_v5 = vmul.f32 %v866_v18, %v220_v26  ;;  %v248_v23 = vld [vmem:[%s841_s5 + $0x198] sm:$0xff]  ;;  %v251_v30 = vld [vmem:[%s841_s5 + $0x1b0] sm:$0xff] }
  0xc2   : > { %340 = vst [vmem:[%s898_s21 + $0x48] sm:$0xff] %v276_v44  ;;  %341 = vst [vmem:[%s898_s21 + $0x50] sm:$0xff] %v277_v45  ;;  %v291_v9 = vmul.f32 %v866_v18, %v221_v31  ;;  %v292_v10 = vmul.f32 %v866_v18, %v222_v32  ;;  %v293_v11 = vmul.f32 %v866_v18, %v223_v33  ;;  %v252_v35 = vld [vmem:[%s841_s5 + $0x1b8] sm:$0xff]  ;;  %v253_v36 = vld [vmem:[%s841_s5 + $0x1c0] sm:$0xff] }
  0xc3   : > { %342 = vst [vmem:[%s898_s21 + $0x58] sm:$0xff] %v278_v46  ;;  %343 = vst [vmem:[%s898_s21 + $0x60] sm:$0xff] %v279_v51  ;;  %v294_v12 = vmul.f32 %v866_v18, %v224_v34  ;;  %v295_v16 = vmul.f32 %v866_v18, %v225_v39  ;;  %v296_v17 = vmul.f32 %v866_v18, %v226_v40  ;;  %v254_v37 = vld [vmem:[%s841_s5 + $0x1c8] sm:$0xff]  ;;  %v256_v43 = vld [vmem:[%s841_s5 + $0x1d8] sm:$0xff] }
  0xc4   : > { %344 = vst [vmem:[%s898_s21 + $0x68] sm:$0xff] %v280_v52  ;;  %345 = vst [vmem:[%s898_s21 + $0x70] sm:$0xff] %v281_v53  ;;  %v297_v19 = vmul.f32 %v866_v18, %v227_v41  ;;  %v298_v20 = vmul.f32 %v866_v18, %v228_v42  ;;  %v299_v24 = vmul.f32 %v866_v18, %v229_v47  ;;  %v255_v42 = vld [vmem:[%s841_s5 + $0x1d0] sm:$0xff]  ;;  %v257_v44 = vld [vmem:[%s841_s5 + $0x1e0] sm:$0xff] }
  0xc5   : > { %346 = vst [vmem:[%s898_s21 + $0x78] sm:$0xff] %v282_v54  ;;  %347 = vst [vmem:[%s898_s21 + $0x80] sm:$0xff] %v283_v59  ;;  %v300_v25 = vmul.f32 %v866_v18, %v230_v48  ;;  %v301_v26 = vmul.f32 %v866_v18, %v231_v49  ;;  %v302_v27 = vmul.f32 %v866_v18, %v232_v50  ;;  %v258_v49 = vld [vmem:[%s841_s5 + $0x1e8] sm:$0xff]  ;;  %v259_v50 = vld [vmem:[%s841_s5 + $0x1f0] sm:$0xff] }
  0xc6   : > { %348 = vst [vmem:[%s898_s21 + $0x88] sm:$0xff] %v284_v60  ;;  %349 = vst [vmem:[%s898_s21 + $0x90] sm:$0xff] %v285_v61  ;;  %v303_v31 = vmul.f32 %v866_v18, %v233_v55  ;;  %v304_v32 = vmul.f32 %v866_v18, %v234_v56  ;;  %v305_v33 = vmul.f32 %v866_v18, %v235_v57  ;;  %v260_v51 = vld [vmem:[%s841_s5 + $0x1f8] sm:$0xff] }
  0xc7   : > { %350 = vst [vmem:[%s898_s21 + $0x98] sm:$0xff] %v286_v62  ;;  %351 = vst [vmem:[%s898_s21 + $0xa0] sm:$0xff] %v287_v2  ;;  %v306_v34 = vmul.f32 %v866_v18, %v236_v58  ;;  %v307_v38 = vmul.f32 %v866_v18, %v237_v63  ;;  %v308_v39 = vmul.f32 %v866_v18, %v238_v0 }
  0xc8   : > { %352 = vst [vmem:[%s898_s21 + $0xa8] sm:$0xff] %v288_v3  ;;  %353 = vst [vmem:[%s898_s21 + $0xb0] sm:$0xff] %v289_v4  ;;  %v309_v40 = vmul.f32 %v866_v18, %v239_v1  ;;  %v310_v41 = vmul.f32 %v866_v18, %v240_v6  ;;  %v311_v45 = vmul.f32 %v866_v18, %v241_v7 }
  0xc9   : > { %354 = vst [vmem:[%s898_s21 + $0xb8] sm:$0xff] %v290_v5  ;;  %355 = vst [vmem:[%s898_s21 + $0xc0] sm:$0xff] %v291_v9  ;;  %v312_v46 = vmul.f32 %v866_v18, %v242_v8  ;;  %v313_v47 = vmul.f32 %v866_v18, %v243_v13  ;;  %v314_v48 = vmul.f32 %v866_v18, %v244_v14 }
  0xca   : > { %356 = vst [vmem:[%s898_s21 + $0xc8] sm:$0xff] %v292_v10  ;;  %357 = vst [vmem:[%s898_s21 + $0xd0] sm:$0xff] %v293_v11  ;;  %v315_v52 = vmul.f32 %v866_v18, %v245_v15  ;;  %v316_v53 = vmul.f32 %v866_v18, %v246_v21  ;;  %v317_v54 = vmul.f32 %v866_v18, %v247_v22 }
  0xcb   : > { %358 = vst [vmem:[%s898_s21 + $0xd8] sm:$0xff] %v294_v12  ;;  %359 = vst [vmem:[%s898_s21 + $0xe0] sm:$0xff] %v295_v16  ;;  %v318_v55 = vmul.f32 %v866_v18, %v248_v23  ;;  %v319_v56 = vmul.f32 %v866_v18, %v249_v28  ;;  %v320_v57 = vmul.f32 %v866_v18, %v250_v29 }
  0xcc   : > { %360 = vst [vmem:[%s898_s21 + $0xe8] sm:$0xff] %v296_v17  ;;  %361 = vst [vmem:[%s898_s21 + $0xf0] sm:$0xff] %v297_v19  ;;  %v321_v58 = vmul.f32 %v866_v18, %v251_v30  ;;  %v322_v59 = vmul.f32 %v866_v18, %v252_v35  ;;  %v323_v60 = vmul.f32 %v866_v18, %v253_v36 }
  0xcd   : > { %362 = vst [vmem:[%s898_s21 + $0xf8] sm:$0xff] %v298_v20  ;;  %363 = vst [vmem:[%s898_s21 + $0x100] sm:$0xff] %v299_v24  ;;  %v324_v61 = vmul.f32 %v866_v18, %v254_v37  ;;  %v325_v62 = vmul.f32 %v866_v18, %v255_v42  ;;  %v326_v63 = vmul.f32 %v866_v18, %v256_v43 }
  0xce   : > { %364 = vst [vmem:[%s898_s21 + $0x108] sm:$0xff] %v300_v25  ;;  %365 = vst [vmem:[%s898_s21 + $0x110] sm:$0xff] %v301_v26  ;;  %v327_v0 = vmul.f32 %v866_v18, %v257_v44  ;;  %v328_v1 = vmul.f32 %v866_v18, %v258_v49  ;;  %v329_v2 = vmul.f32 %v866_v18, %v259_v50 }
  0xcf   : > { %366 = vst [vmem:[%s898_s21 + $0x118] sm:$0xff] %v302_v27  ;;  %367 = vst [vmem:[%s898_s21 + $0x120] sm:$0xff] %v303_v31  ;;  %v330_v3 = vmul.f32 %v866_v18, %v260_v51 }
  0xd0   : > { %368 = vst [vmem:[%s898_s21 + $0x128] sm:$0xff] %v304_v32  ;;  %369 = vst [vmem:[%s898_s21 + $0x130] sm:$0xff] %v305_v33 }
  0xd1   : > { %370 = vst [vmem:[%s898_s21 + $0x138] sm:$0xff] %v306_v34  ;;  %371 = vst [vmem:[%s898_s21 + $0x140] sm:$0xff] %v307_v38 }
  0xd2   : > { %372 = vst [vmem:[%s898_s21 + $0x148] sm:$0xff] %v308_v39  ;;  %373 = vst [vmem:[%s898_s21 + $0x150] sm:$0xff] %v309_v40 }
  0xd3   : > { %374 = vst [vmem:[%s898_s21 + $0x158] sm:$0xff] %v310_v41  ;;  %375 = vst [vmem:[%s898_s21 + $0x160] sm:$0xff] %v311_v45 }
  0xd4   : > { %376 = vst [vmem:[%s898_s21 + $0x168] sm:$0xff] %v312_v46  ;;  %377 = vst [vmem:[%s898_s21 + $0x170] sm:$0xff] %v313_v47 }
  0xd5   : > { %378 = vst [vmem:[%s898_s21 + $0x178] sm:$0xff] %v314_v48  ;;  %379 = vst [vmem:[%s898_s21 + $0x180] sm:$0xff] %v315_v52 }
  0xd6   : > { %380 = vst [vmem:[%s898_s21 + $0x188] sm:$0xff] %v316_v53  ;;  %381 = vst [vmem:[%s898_s21 + $0x190] sm:$0xff] %v317_v54 }
  0xd7   : > { %382 = vst [vmem:[%s898_s21 + $0x198] sm:$0xff] %v318_v55  ;;  %383 = vst [vmem:[%s898_s21 + $0x1a0] sm:$0xff] %v319_v56 }
  0xd8   : > { %384 = vst [vmem:[%s898_s21 + $0x1a8] sm:$0xff] %v320_v57  ;;  %385 = vst [vmem:[%s898_s21 + $0x1b0] sm:$0xff] %v321_v58 }
  0xd9   : > { %386 = vst [vmem:[%s898_s21 + $0x1b8] sm:$0xff] %v322_v59  ;;  %387 = vst [vmem:[%s898_s21 + $0x1c0] sm:$0xff] %v323_v60 }
  0xda   : > { %388 = vst [vmem:[%s898_s21 + $0x1c8] sm:$0xff] %v324_v61  ;;  %389 = vst [vmem:[%s898_s21 + $0x1d0] sm:$0xff] %v325_v62 }
  0xdb   : > { %390 = vst [vmem:[%s898_s21 + $0x1d8] sm:$0xff] %v326_v63  ;;  %391 = vst [vmem:[%s898_s21 + $0x1e0] sm:$0xff] %v327_v0 }
  0xdc   : > { %392 = vst [vmem:[%s898_s21 + $0x1e8] sm:$0xff] %v328_v1  ;;  %393 = vst [vmem:[%s898_s21 + $0x1f0] sm:$0xff] %v329_v2 }
  0xdd   : > { %394 = vst [vmem:[%s898_s21 + $0x1f8] sm:$0xff] %v330_v3 }
  0xde   : > { %636 = shalt.err (!%p633_p5)
}
  0xdf   : > { %s637_s26 = scalar_lea.hbm %s1045_s15, 8192  ;;  %s641_s29 = scalar_lea.hbm %s1103_s2, 65536 }
  0xe0   : > { %p638_p4 = scmp.ne.s32.totalorder %s1045_s15, %s637_s26  ;;  %p642_p0 = scmp.lt.u32.totalorder %s1045_s15, %s1103_s2 }
  0xe1   : > { %p643_p1 = scmp.lt.u32.totalorder %s641_s29, %s637_s26  ;;  %p645_p8 = scmp.lt.u32.totalorder %s637_s26, %s1045_s15 }
  0xe2   : > { %p639_p7 = pnand %p638_p4, %p1112_p9 }
  0xe3   : > { %p644_p3 = por %p643_p1, %p642_p0 }
  0xe4   : > { %p640_p10 = pneg %p639_p7 }
  0xe5   : > { %p646_p11 = por %p645_p8, %p644_p3 }
  0xe7   : > { %p647_p13 = pnand %p646_p11, %p640_p10 }
  0xe9   : > { %650 = shalt.err (!%p647_p13)
}
  0xea   : > { %531 = dma.vmem_to_hbm [thread:$0]  (%p1112_p9), %s1047_s7, 8192, %s1045_s15, %s396_s16  }
  0xeb PF: > { %p542_p6 = scmp.ge.s32.totalorder %s705_s14, 2  ;;  %s424_s30 = sand.u32 1, %s685_s9  }
  0xec   : > { %p1113_p12 = scmp.ne.s32.totalorder %s1108_s24, 0  ;;  %s425_s4 = scalar_lea.sflag [#allocation4], %s424_s30 }
  0xee   : > { %p538_p2 = pnand %p542_p6, %p1113_p12 }
  0xf0   : > { %680 = dma.done.wait (!%p538_p2), %s425_s4, 8192  }
  0xf1   : > { %682 = vsyncadd (!%p538_p2), %s425_s4, 4294959104  ;;  %s18_s14 = sadd.s32 1, %s705_s14   ;;  %s1114_s9 = smov %s689_s10 }
  0xf2   : > { %p15_p5 = scmp.ge.s32.totalorder %s18_s14, 10   ;;  %s1115_s10 = smov %s693_s11 }
  0xf3   : > { %s1116_s11 = smov %s781_s23  ;;  %s1117_s12 = smov %s701_s13 }
  0xf4   : > { %s1118_s13 = smov %s1120_s17  ;;  %17 = sbr.rel (!%p15_p5) target bundleno = 6 (0x6), region = 76 }
  0xfb   :  { %430 = vsyncpa [#allocation3], 1 }
  0xfc   :  { %432 = vsyncpa [#allocation3 + $0x1], 1 }
  0xfd   :  { %433 = vsyncpa [#allocation4], 1 }
  0xfe   :  { %435 = vsyncpa [#allocation4 + $0x1], 1 }

</bundles_post_ra>
